<compile_context>
chip_gen: v6e
topology: v6e:2x2x1
jax: 0.10.0
libtpu: 0.0.40
codegen_flags: <defaults>
</compile_context>

<pallas_src>
import functools

import numpy as np
import jax
import jax.numpy as jnp
from jax.experimental import pallas as pl
from jax.experimental.pallas import tpu as pltpu


def residual_block_kernel(x_ref, w1_ref, b1_ref, w2_ref, b2_ref, o_ref, p_ref,
                          *, N, C, H, W):
    """One invocation computes the whole batch.

    x_ref : (N*C, H*W)  NCHW input with H*W flattened onto the lane axis
    w1/w2 : (C, 9*C)    BN-folded conv weights; column = (3*dy + dx)*Cin + cin
    b1/b2 : (C, 1)      BN-folded biases
    o_ref : (N*C, H*W)  output, same layout as the input
    p_ref : (9*C, H*W)  VMEM im2col scratch, reused by both convs / all batches
    """
    HW = H * W
    f32 = jnp.float32

    # Destination-pixel column masks for the dx = -1 / +1 taps.  (The dy = +-1
    # row overflow lands outside [0, H*W) in the flat layout and is handled by
    # the one-time zero fill below.)  Built once, shared by convs and batches.
    col = jax.lax.broadcasted_iota(jnp.int32, (C, HW), 1) % W
    left_ok = col >= 1            # tap reads (h+oy, w-1): invalid at w == 0
    right_ok = col <= W - 2       # tap reads (h+oy, w+1): invalid at w == W-1

    # Zero the scratch once: the per-tap out-of-image lane strips stay zero for
    # every subsequent conv (the in-image stores below never touch them).
    p_ref[...] = jnp.zeros(p_ref.shape, p_ref.dtype)

    w1 = w1_ref[...]
    w2 = w2_ref[...]
    b1 = b1_ref[...].astype(f32)
    b2 = b2_ref[...].astype(f32)

    def conv3x3(img, wmat, b):
        # Fused im2col: scatter the nine shifted taps into the patch scratch
        # with static lane-offset stores (lane-dense rows), then contract all
        # taps * channels in ONE MXU matmul (K = 9*Cin, f32 accumulation).
        for dy in range(3):
            for dx in range(3):
                oy, ox = dy - 1, dx - 1
                s = oy * W + ox                 # flat source offset
                lo = max(0, -s)                 # first valid destination lane
                hi = HW - max(0, s)             # one past last valid dest lane
                val = img[:, lo + s:hi + s]     # = img shifted by s, in-range
                if ox == -1:
                    val = jnp.where(left_ok[:, lo:hi], val, 0)
                elif ox == 1:
                    val = jnp.where(right_ok[:, lo:hi], val, 0)
                t = 3 * dy + dx
                p_ref[t * C:(t + 1) * C, lo:hi] = val
        return jnp.dot(wmat, p_ref[...], preferred_element_type=f32) + b

    for n in range(N):                          # whole batch, one invocation
        xi = x_ref[n * C:(n + 1) * C, :]        # (C, H*W), residual source
        h = jnp.maximum(conv3x3(xi, w1, b1), 0.0)          # conv1+BN1+ReLU, f32
        # TODO(synk): for bf16 storage this cast adds one rounding step between
        #             the convs vs a pure-f32 reference (exact for f32 here).
        y = conv3x3(h.astype(xi.dtype), w2, b2) + xi.astype(f32)
        o_ref[n * C:(n + 1) * C, :] = jnp.maximum(y, 0.0).astype(o_ref.dtype)


def residual_block_nchw(x_nchw, params):
    """NCHW in / NCHW out, matching the PyTorch module (eval-mode BN folded).

    No transposes on the hot path: NCHW with H*W flattened onto the lane axis
    is already the lane-dense layout the kernel computes in (reshapes of
    trailing contiguous dims are free)."""
    w1, b1, w2, b2 = params
    N, C, H, W = x_nchw.shape
    HW = H * W
    x2d = x_nchw.reshape(N * C, HW)
    kernel = functools.partial(residual_block_kernel, N=N, C=C, H=H, W=W)
    vmem = pl.BlockSpec(memory_space=pltpu.MemorySpace.VMEM)
    y2d = pl.pallas_call(
        kernel,
        out_shape=jax.ShapeDtypeStruct((N * C, HW), x_nchw.dtype),
        in_specs=[vmem, vmem, vmem, vmem, vmem],
        out_specs=vmem,
        scratch_shapes=[pltpu.VMEM((9 * C, HW), x_nchw.dtype)],
    )(x2d, w1, b1, w2, b2)
    return y2d.reshape(N, C, H, W)


def fold_bn(w_oihw, b, gamma, beta, mean, var, eps=1e-5):
    """Fold eval-mode BatchNorm into the conv.  Returns
       w_eff: (Cout, 9*Cin) with column index (3*dy + dx)*Cin + cin,
       b_eff: (Cout, 1),
    kept in the parameter dtype (bf16 params would feed the MXU as bf16)."""
    cout, cin = w_oihw.shape[0], w_oihw.shape[1]
    scale = gamma / jnp.sqrt(var + eps)                       # (Cout,)
    shift = beta - scale * mean                               # (Cout,)
    w_scaled = w_oihw * scale[:, None, None, None]            # (O, I, 3, 3)
    w_eff = jnp.transpose(w_scaled, (0, 2, 3, 1)).reshape(cout, 9 * cin)
    b_eff = (scale * b + shift).reshape(cout, 1)
    return w_eff.astype(w_oihw.dtype), b_eff.astype(w_oihw.dtype)


def ref_forward_nchw(x, w1, b1, bn1, w2, b2, bn2, eps=1e-5):
    """Pure-JAX reference mirroring the PyTorch (eval-mode) forward."""
    def conv(x, w, b):
        y = jax.lax.conv_general_dilated(
            x, w, (1, 1), 'SAME',
            dimension_numbers=('NCHW', 'OIHW', 'NCHW'))
        return y + b[None, :, None, None]

    def bn(y, p):
        g, be, m, v = p
        inv = g / jnp.sqrt(v + eps)
        return inv[None, :, None, None] * (y - m[None, :, None, None]) \
            + be[None, :, None, None]

    h = jax.nn.relu(bn(conv(x, w1, b1), bn1))
    y = bn(conv(h, w2, b2), bn2)
    return jax.nn.relu(x + y)


if __name__ == "__main__":
    N, C, H, W = 2, 4, 16, 16
    key = jax.random.PRNGKey(0)
    ks = jax.random.split(key, 16)

    x = jax.random.normal(ks[0], (N, C, H, W), jnp.float32)

    # conv1 / BN1 params
    w1 = 0.1 * jax.random.normal(ks[1], (C, C, 3, 3), jnp.float32)
    b1 = 0.1 * jax.random.normal(ks[2], (C,), jnp.float32)
    g1 = 1.0 + 0.1 * jax.random.normal(ks[3], (C,), jnp.float32)
    be1 = 0.1 * jax.random.normal(ks[4], (C,), jnp.float32)
    m1 = 0.1 * jax.random.normal(ks[5], (C,), jnp.float32)
    v1 = 0.5 + jnp.abs(jax.random.normal(ks[6], (C,), jnp.float32))

    # conv2 / BN2 params
    w2 = 0.1 * jax.random.normal(ks[7], (C, C, 3, 3), jnp.float32)
    b2 = 0.1 * jax.random.normal(ks[8], (C,), jnp.float32)
    g2 = 1.0 + 0.1 * jax.random.normal(ks[9], (C,), jnp.float32)
    be2 = 0.1 * jax.random.normal(ks[10], (C,), jnp.float32)
    m2 = 0.1 * jax.random.normal(ks[11], (C,), jnp.float32)
    v2 = 0.5 + jnp.abs(jax.random.normal(ks[12], (C,), jnp.float32))

    # Fold BN into the convs (eval-mode semantics), pre-shape weights once.
    w1e, b1e = fold_bn(w1, b1, g1, be1, m1, v1)
    w2e, b2e = fold_bn(w2, b2, g2, be2, m2, v2)

    out = residual_block_nchw(x, (w1e, b1e, w2e, b2e))
    out = jax.block_until_ready(out)

    ref = ref_forward_nchw(x, w1, b1, (g1, be1, m1, v1),
                           w2, b2, (g2, be2, m2, v2))
    ref = jax.block_until_ready(ref)

    assert out.shape == (N, C, H, W)
    np.testing.assert_allclose(np.asarray(out), np.asarray(ref),
                               rtol=1e-4, atol=1e-4)
    print("KERNEL_OK")
</pallas_src>

<mosaic_0001>
module attributes {stable_mosaic.version = 11 : i64} {
  func.func @residual_block_kernel(%arg0: memref<8x256xf32, #tpu.memory_space<vmem>>, %arg1: memref<4x36xf32, #tpu.memory_space<vmem>>, %arg2: memref<4x1xf32, #tpu.memory_space<vmem>>, %arg3: memref<4x36xf32, #tpu.memory_space<vmem>>, %arg4: memref<4x1xf32, #tpu.memory_space<vmem>>, %arg5: memref<8x256xf32, #tpu.memory_space<vmem>>, %arg6: memref<36x256xf32, #tpu.memory_space<vmem>>) attributes {dimension_semantics = [], scalar_prefetch = 0 : i64, scratch_operands = 1 : i64, tpu.core_type = #tpu.core_type<tc>} {
    %0 = tpu.iota {dimensions = array<i32: 1>} : vector<4x256xi32>
    %c16_i32 = arith.constant 16 : i32
    %c0_i32 = arith.constant 0 : i32
    %1 = arith.cmpi eq, %c16_i32, %c0_i32 : i32
    %c1_i32 = arith.constant 1 : i32
    %2 = arith.select %1, %c1_i32, %c16_i32 : i32
    %3 = vector.broadcast %2 : i32 to vector<4x256xi32>
    %4 = arith.remsi %0, %3 : vector<4x256xi32>
    %c0_i32_0 = arith.constant 0 : i32
    %5 = vector.broadcast %c0_i32_0 : i32 to vector<4x256xi32>
    %6 = arith.cmpi ne, %4, %5 : vector<4x256xi32>
    %c0_i32_1 = arith.constant 0 : i32
    %7 = vector.broadcast %c0_i32_1 : i32 to vector<4x256xi32>
    %8 = arith.cmpi slt, %4, %7 : vector<4x256xi32>
    %c0_i32_2 = arith.constant 0 : i32
    %9 = arith.cmpi slt, %2, %c0_i32_2 : i32
    %10 = vector.broadcast %9 : i1 to vector<4x256xi1>
    %11 = vector.broadcast %10 : vector<4x256xi1> to vector<4x256xi1>
    %12 = arith.xori %8, %11 : vector<4x256xi1>
    %13 = arith.andi %12, %6 : vector<4x256xi1>
    %14 = vector.broadcast %2 : i32 to vector<4x256xi32>
    %15 = arith.addi %4, %14 : vector<4x256xi32>
    %16 = arith.select %13, %15, %4 : vector<4x256xi1>, vector<4x256xi32>
    %c1_i32_3 = arith.constant 1 : i32
    %17 = vector.broadcast %c1_i32_3 : i32 to vector<4x256xi32>
    %18 = arith.cmpi sge, %16, %17 : vector<4x256xi32>
    %c14_i32 = arith.constant 14 : i32
    %19 = vector.broadcast %c14_i32 : i32 to vector<4x256xi32>
    %20 = arith.cmpi sle, %16, %19 : vector<4x256xi32>
    %cst = arith.constant 0.000000e+00 : f32
    %21 = vector.broadcast %cst : f32 to vector<36x256xf32>
    %c0 = arith.constant 0 : index
    %c0_4 = arith.constant 0 : index
    %22 = vector.load %arg6[%c0, %c0_4] : memref<36x256xf32, #tpu.memory_space<vmem>>, vector<36x256xf32>
    tpu.vector_store %arg6[%c0, %c0_4], %21 {strides = array<i32>} : memref<36x256xf32, #tpu.memory_space<vmem>>, vector<36x256xf32>,
    %c0_5 = arith.constant 0 : index
    %c0_6 = arith.constant 0 : index
    %23 = vector.load %arg1[%c0_5, %c0_6] : memref<4x36xf32, #tpu.memory_space<vmem>>, vector<4x36xf32>
    %c0_7 = arith.constant 0 : index
    %c0_8 = arith.constant 0 : index
    %24 = vector.load %arg3[%c0_7, %c0_8] : memref<4x36xf32, #tpu.memory_space<vmem>>, vector<4x36xf32>
    %c0_9 = arith.constant 0 : index
    %c0_10 = arith.constant 0 : index
    %25 = vector.load %arg2[%c0_9, %c0_10] : memref<4x1xf32, #tpu.memory_space<vmem>>, vector<4x1xf32>
    %c0_11 = arith.constant 0 : index
    %c0_12 = arith.constant 0 : index
    %26 = vector.load %arg4[%c0_11, %c0_12] : memref<4x1xf32, #tpu.memory_space<vmem>>, vector<4x1xf32>
    %c0_13 = arith.constant 0 : index
    %c0_14 = arith.constant 0 : index
    %27 = vector.load %arg0[%c0_13, %c0_14] : memref<8x256xf32, #tpu.memory_space<vmem>>, vector<4x256xf32>
    %28 = vector.extract_strided_slice %27 {offsets = [0, 0], sizes = [4, 239], strides = [1, 1]} : vector<4x256xf32> to vector<4x239xf32>
    %29 = vector.extract_strided_slice %18 {offsets = [0, 17], sizes = [4, 239], strides = [1, 1]} : vector<4x256xi1> to vector<4x239xi1>
    %c0_i32_15 = arith.constant 0 : i32
    %30 = arith.sitofp %c0_i32_15 : i32 to f32
    %31 = vector.broadcast %30 : f32 to vector<4x239xf32>
    %32 = arith.select %29, %28, %31 : vector<4x239xi1>, vector<4x239xf32>
    %c0_16 = arith.constant 0 : index
    %c17 = arith.constant 17 : index
    %33 = vector.load %arg6[%c0_16, %c17] : memref<36x256xf32, #tpu.memory_space<vmem>>, vector<4x239xf32>
    tpu.vector_store %arg6[%c0_16, %c17], %32 {strides = array<i32>} : memref<36x256xf32, #tpu.memory_space<vmem>>, vector<4x239xf32>,
    %34 = vector.extract_strided_slice %27 {offsets = [0, 0], sizes = [4, 240], strides = [1, 1]} : vector<4x256xf32> to vector<4x240xf32>
    %c4 = arith.constant 4 : index
    %c16 = arith.constant 16 : index
    %35 = vector.load %arg6[%c4, %c16] : memref<36x256xf32, #tpu.memory_space<vmem>>, vector<4x240xf32>
    tpu.vector_store %arg6[%c4, %c16], %34 {strides = array<i32>} : memref<36x256xf32, #tpu.memory_space<vmem>>, vector<4x240xf32>,
    %36 = vector.extract_strided_slice %27 {offsets = [0, 0], sizes = [4, 241], strides = [1, 1]} : vector<4x256xf32> to vector<4x241xf32>
    %37 = vector.extract_strided_slice %20 {offsets = [0, 15], sizes = [4, 241], strides = [1, 1]} : vector<4x256xi1> to vector<4x241xi1>
    %c0_i32_17 = arith.constant 0 : i32
    %38 = arith.sitofp %c0_i32_17 : i32 to f32
    %39 = vector.broadcast %38 : f32 to vector<4x241xf32>
    %40 = arith.select %37, %36, %39 : vector<4x241xi1>, vector<4x241xf32>
    %c8 = arith.constant 8 : index
    %c15 = arith.constant 15 : index
    %41 = vector.load %arg6[%c8, %c15] : memref<36x256xf32, #tpu.memory_space<vmem>>, vector<4x241xf32>
    tpu.vector_store %arg6[%c8, %c15], %40 {strides = array<i32>} : memref<36x256xf32, #tpu.memory_space<vmem>>, vector<4x241xf32>,
    %42 = vector.extract_strided_slice %27 {offsets = [0, 0], sizes = [4, 255], strides = [1, 1]} : vector<4x256xf32> to vector<4x255xf32>
    %43 = vector.extract_strided_slice %18 {offsets = [0, 1], sizes = [4, 255], strides = [1, 1]} : vector<4x256xi1> to vector<4x255xi1>
    %c0_i32_18 = arith.constant 0 : i32
    %44 = arith.sitofp %c0_i32_18 : i32 to f32
    %45 = vector.broadcast %44 : f32 to vector<4x255xf32>
    %46 = arith.select %43, %42, %45 : vector<4x255xi1>, vector<4x255xf32>
    %c12 = arith.constant 12 : index
    %c1 = arith.constant 1 : index
    %47 = vector.load %arg6[%c12, %c1] : memref<36x256xf32, #tpu.memory_space<vmem>>, vector<4x255xf32>
    tpu.vector_store %arg6[%c12, %c1], %46 {strides = array<i32>} : memref<36x256xf32, #tpu.memory_space<vmem>>, vector<4x255xf32>,
    %c16_19 = arith.constant 16 : index
    %c0_20 = arith.constant 0 : index
    %48 = vector.load %arg6[%c16_19, %c0_20] : memref<36x256xf32, #tpu.memory_space<vmem>>, vector<4x256xf32>
    tpu.vector_store %arg6[%c16_19, %c0_20], %27 {strides = array<i32>} : memref<36x256xf32, #tpu.memory_space<vmem>>, vector<4x256xf32>,
    %49 = vector.extract_strided_slice %27 {offsets = [0, 1], sizes = [4, 255], strides = [1, 1]} : vector<4x256xf32> to vector<4x255xf32>
    %50 = vector.extract_strided_slice %20 {offsets = [0, 0], sizes = [4, 255], strides = [1, 1]} : vector<4x256xi1> to vector<4x255xi1>
    %c0_i32_21 = arith.constant 0 : i32
    %51 = arith.sitofp %c0_i32_21 : i32 to f32
    %52 = vector.broadcast %51 : f32 to vector<4x255xf32>
    %53 = arith.select %50, %49, %52 : vector<4x255xi1>, vector<4x255xf32>
    %c20 = arith.constant 20 : index
    %c0_22 = arith.constant 0 : index
    %54 = vector.load %arg6[%c20, %c0_22] : memref<36x256xf32, #tpu.memory_space<vmem>>, vector<4x255xf32>
    tpu.vector_store %arg6[%c20, %c0_22], %53 {strides = array<i32>} : memref<36x256xf32, #tpu.memory_space<vmem>>, vector<4x255xf32>,
    %55 = vector.extract_strided_slice %27 {offsets = [0, 15], sizes = [4, 241], strides = [1, 1]} : vector<4x256xf32> to vector<4x241xf32>
    %56 = vector.extract_strided_slice %18 {offsets = [0, 0], sizes = [4, 241], strides = [1, 1]} : vector<4x256xi1> to vector<4x241xi1>
    %c0_i32_23 = arith.constant 0 : i32
    %57 = arith.sitofp %c0_i32_23 : i32 to f32
    %58 = vector.broadcast %57 : f32 to vector<4x241xf32>
    %59 = arith.select %56, %55, %58 : vector<4x241xi1>, vector<4x241xf32>
    %c24 = arith.constant 24 : index
    %c0_24 = arith.constant 0 : index
    %60 = vector.load %arg6[%c24, %c0_24] : memref<36x256xf32, #tpu.memory_space<vmem>>, vector<4x241xf32>
    tpu.vector_store %arg6[%c24, %c0_24], %59 {strides = array<i32>} : memref<36x256xf32, #tpu.memory_space<vmem>>, vector<4x241xf32>,
    %61 = vector.extract_strided_slice %27 {offsets = [0, 16], sizes = [4, 240], strides = [1, 1]} : vector<4x256xf32> to vector<4x240xf32>
    %c28 = arith.constant 28 : index
    %c0_25 = arith.constant 0 : index
    %62 = vector.load %arg6[%c28, %c0_25] : memref<36x256xf32, #tpu.memory_space<vmem>>, vector<4x240xf32>
    tpu.vector_store %arg6[%c28, %c0_25], %61 {strides = array<i32>} : memref<36x256xf32, #tpu.memory_space<vmem>>, vector<4x240xf32>,
    %63 = vector.extract_strided_slice %27 {offsets = [0, 17], sizes = [4, 239], strides = [1, 1]} : vector<4x256xf32> to vector<4x239xf32>
    %64 = vector.extract_strided_slice %20 {offsets = [0, 0], sizes = [4, 239], strides = [1, 1]} : vector<4x256xi1> to vector<4x239xi1>
    %c0_i32_26 = arith.constant 0 : i32
    %65 = arith.sitofp %c0_i32_26 : i32 to f32
    %66 = vector.broadcast %65 : f32 to vector<4x239xf32>
    %67 = arith.select %64, %63, %66 : vector<4x239xi1>, vector<4x239xf32>
    %c32 = arith.constant 32 : index
    %c0_27 = arith.constant 0 : index
    %68 = vector.load %arg6[%c32, %c0_27] : memref<36x256xf32, #tpu.memory_space<vmem>>, vector<4x239xf32>
    tpu.vector_store %arg6[%c32, %c0_27], %67 {strides = array<i32>} : memref<36x256xf32, #tpu.memory_space<vmem>>, vector<4x239xf32>,
    %c0_28 = arith.constant 0 : index
    %c0_29 = arith.constant 0 : index
    %69 = vector.load %arg6[%c0_28, %c0_29] : memref<36x256xf32, #tpu.memory_space<vmem>>, vector<36x256xf32>
    %cst_30 = arith.constant dense<0.000000e+00> : vector<4x256xf32>
    %70 = tpu.matmul %23, %69, %cst_30 {dimension_numbers = #tpu.dot_dimension_numbers<[1], [0], [0], [1], [0, 0, 1, 1], [], []>} : vector<4x36xf32>, vector<36x256xf32>, vector<4x256xf32> -> vector<4x256xf32>
    %71 = vector.broadcast %25 : vector<4x1xf32> to vector<4x256xf32>
    %72 = arith.addf %70, %71 : vector<4x256xf32>
    %cst_31 = arith.constant 0.000000e+00 : f32
    %73 = vector.broadcast %cst_31 : f32 to vector<4x256xf32>
    %74 = arith.maximumf %72, %73 : vector<4x256xf32>
    %75 = vector.extract_strided_slice %74 {offsets = [0, 0], sizes = [4, 239], strides = [1, 1]} : vector<4x256xf32> to vector<4x239xf32>
    %76 = vector.extract_strided_slice %18 {offsets = [0, 17], sizes = [4, 239], strides = [1, 1]} : vector<4x256xi1> to vector<4x239xi1>
    %c0_i32_32 = arith.constant 0 : i32
    %77 = arith.sitofp %c0_i32_32 : i32 to f32
    %78 = vector.broadcast %77 : f32 to vector<4x239xf32>
    %79 = arith.select %76, %75, %78 : vector<4x239xi1>, vector<4x239xf32>
    %c0_33 = arith.constant 0 : index
    %c17_34 = arith.constant 17 : index
    %80 = vector.load %arg6[%c0_33, %c17_34] : memref<36x256xf32, #tpu.memory_space<vmem>>, vector<4x239xf32>
    tpu.vector_store %arg6[%c0_33, %c17_34], %79 {strides = array<i32>} : memref<36x256xf32, #tpu.memory_space<vmem>>, vector<4x239xf32>,
    %81 = vector.extract_strided_slice %74 {offsets = [0, 0], sizes = [4, 240], strides = [1, 1]} : vector<4x256xf32> to vector<4x240xf32>
    %c4_35 = arith.constant 4 : index
    %c16_36 = arith.constant 16 : index
    %82 = vector.load %arg6[%c4_35, %c16_36] : memref<36x256xf32, #tpu.memory_space<vmem>>, vector<4x240xf32>
    tpu.vector_store %arg6[%c4_35, %c16_36], %81 {strides = array<i32>} : memref<36x256xf32, #tpu.memory_space<vmem>>, vector<4x240xf32>,
    %83 = vector.extract_strided_slice %74 {offsets = [0, 0], sizes = [4, 241], strides = [1, 1]} : vector<4x256xf32> to vector<4x241xf32>
    %84 = vector.extract_strided_slice %20 {offsets = [0, 15], sizes = [4, 241], strides = [1, 1]} : vector<4x256xi1> to vector<4x241xi1>
    %c0_i32_37 = arith.constant 0 : i32
    %85 = arith.sitofp %c0_i32_37 : i32 to f32
    %86 = vector.broadcast %85 : f32 to vector<4x241xf32>
    %87 = arith.select %84, %83, %86 : vector<4x241xi1>, vector<4x241xf32>
    %c8_38 = arith.constant 8 : index
    %c15_39 = arith.constant 15 : index
    %88 = vector.load %arg6[%c8_38, %c15_39] : memref<36x256xf32, #tpu.memory_space<vmem>>, vector<4x241xf32>
    tpu.vector_store %arg6[%c8_38, %c15_39], %87 {strides = array<i32>} : memref<36x256xf32, #tpu.memory_space<vmem>>, vector<4x241xf32>,
    %89 = vector.extract_strided_slice %74 {offsets = [0, 0], sizes = [4, 255], strides = [1, 1]} : vector<4x256xf32> to vector<4x255xf32>
    %90 = vector.extract_strided_slice %18 {offsets = [0, 1], sizes = [4, 255], strides = [1, 1]} : vector<4x256xi1> to vector<4x255xi1>
    %c0_i32_40 = arith.constant 0 : i32
    %91 = arith.sitofp %c0_i32_40 : i32 to f32
    %92 = vector.broadcast %91 : f32 to vector<4x255xf32>
    %93 = arith.select %90, %89, %92 : vector<4x255xi1>, vector<4x255xf32>
    %c12_41 = arith.constant 12 : index
    %c1_42 = arith.constant 1 : index
    %94 = vector.load %arg6[%c12_41, %c1_42] : memref<36x256xf32, #tpu.memory_space<vmem>>, vector<4x255xf32>
    tpu.vector_store %arg6[%c12_41, %c1_42], %93 {strides = array<i32>} : memref<36x256xf32, #tpu.memory_space<vmem>>, vector<4x255xf32>,
    %c16_43 = arith.constant 16 : index
    %c0_44 = arith.constant 0 : index
    %95 = vector.load %arg6[%c16_43, %c0_44] : memref<36x256xf32, #tpu.memory_space<vmem>>, vector<4x256xf32>
    tpu.vector_store %arg6[%c16_43, %c0_44], %74 {strides = array<i32>} : memref<36x256xf32, #tpu.memory_space<vmem>>, vector<4x256xf32>,
    %96 = vector.extract_strided_slice %74 {offsets = [0, 1], sizes = [4, 255], strides = [1, 1]} : vector<4x256xf32> to vector<4x255xf32>
    %97 = vector.extract_strided_slice %20 {offsets = [0, 0], sizes = [4, 255], strides = [1, 1]} : vector<4x256xi1> to vector<4x255xi1>
    %c0_i32_45 = arith.constant 0 : i32
    %98 = arith.sitofp %c0_i32_45 : i32 to f32
    %99 = vector.broadcast %98 : f32 to vector<4x255xf32>
    %100 = arith.select %97, %96, %99 : vector<4x255xi1>, vector<4x255xf32>
    %c20_46 = arith.constant 20 : index
    %c0_47 = arith.constant 0 : index
    %101 = vector.load %arg6[%c20_46, %c0_47] : memref<36x256xf32, #tpu.memory_space<vmem>>, vector<4x255xf32>
    tpu.vector_store %arg6[%c20_46, %c0_47], %100 {strides = array<i32>} : memref<36x256xf32, #tpu.memory_space<vmem>>, vector<4x255xf32>,
    %102 = vector.extract_strided_slice %74 {offsets = [0, 15], sizes = [4, 241], strides = [1, 1]} : vector<4x256xf32> to vector<4x241xf32>
    %103 = vector.extract_strided_slice %18 {offsets = [0, 0], sizes = [4, 241], strides = [1, 1]} : vector<4x256xi1> to vector<4x241xi1>
    %c0_i32_48 = arith.constant 0 : i32
    %104 = arith.sitofp %c0_i32_48 : i32 to f32
    %105 = vector.broadcast %104 : f32 to vector<4x241xf32>
    %106 = arith.select %103, %102, %105 : vector<4x241xi1>, vector<4x241xf32>
    %c24_49 = arith.constant 24 : index
    %c0_50 = arith.constant 0 : index
    %107 = vector.load %arg6[%c24_49, %c0_50] : memref<36x256xf32, #tpu.memory_space<vmem>>, vector<4x241xf32>
    tpu.vector_store %arg6[%c24_49, %c0_50], %106 {strides = array<i32>} : memref<36x256xf32, #tpu.memory_space<vmem>>, vector<4x241xf32>,
    %108 = vector.extract_strided_slice %74 {offsets = [0, 16], sizes = [4, 240], strides = [1, 1]} : vector<4x256xf32> to vector<4x240xf32>
    %c28_51 = arith.constant 28 : index
    %c0_52 = arith.constant 0 : index
    %109 = vector.load %arg6[%c28_51, %c0_52] : memref<36x256xf32, #tpu.memory_space<vmem>>, vector<4x240xf32>
    tpu.vector_store %arg6[%c28_51, %c0_52], %108 {strides = array<i32>} : memref<36x256xf32, #tpu.memory_space<vmem>>, vector<4x240xf32>,
    %110 = vector.extract_strided_slice %74 {offsets = [0, 17], sizes = [4, 239], strides = [1, 1]} : vector<4x256xf32> to vector<4x239xf32>
    %111 = vector.extract_strided_slice %20 {offsets = [0, 0], sizes = [4, 239], strides = [1, 1]} : vector<4x256xi1> to vector<4x239xi1>
    %c0_i32_53 = arith.constant 0 : i32
    %112 = arith.sitofp %c0_i32_53 : i32 to f32
    %113 = vector.broadcast %112 : f32 to vector<4x239xf32>
    %114 = arith.select %111, %110, %113 : vector<4x239xi1>, vector<4x239xf32>
    %c32_54 = arith.constant 32 : index
    %c0_55 = arith.constant 0 : index
    %115 = vector.load %arg6[%c32_54, %c0_55] : memref<36x256xf32, #tpu.memory_space<vmem>>, vector<4x239xf32>
    tpu.vector_store %arg6[%c32_54, %c0_55], %114 {strides = array<i32>} : memref<36x256xf32, #tpu.memory_space<vmem>>, vector<4x239xf32>,
    %c0_56 = arith.constant 0 : index
    %c0_57 = arith.constant 0 : index
    %116 = vector.load %arg6[%c0_56, %c0_57] : memref<36x256xf32, #tpu.memory_space<vmem>>, vector<36x256xf32>
    %cst_58 = arith.constant dense<0.000000e+00> : vector<4x256xf32>
    %117 = tpu.matmul %24, %116, %cst_58 {dimension_numbers = #tpu.dot_dimension_numbers<[1], [0], [0], [1], [0, 0, 1, 1], [], []>} : vector<4x36xf32>, vector<36x256xf32>, vector<4x256xf32> -> vector<4x256xf32>
    %118 = vector.broadcast %26 : vector<4x1xf32> to vector<4x256xf32>
    %119 = arith.addf %117, %118 : vector<4x256xf32>
    %120 = arith.addf %119, %27 : vector<4x256xf32>
    %cst_59 = arith.constant 0.000000e+00 : f32
    %121 = vector.broadcast %cst_59 : f32 to vector<4x256xf32>
    %122 = arith.maximumf %120, %121 : vector<4x256xf32>
    %c0_60 = arith.constant 0 : index
    %c0_61 = arith.constant 0 : index
    %123 = vector.load %arg5[%c0_60, %c0_61] : memref<8x256xf32, #tpu.memory_space<vmem>>, vector<4x256xf32>
    tpu.vector_store %arg5[%c0_60, %c0_61], %122 {strides = array<i32>} : memref<8x256xf32, #tpu.memory_space<vmem>>, vector<4x256xf32>,
    %c4_62 = arith.constant 4 : index
    %c0_63 = arith.constant 0 : index
    %124 = vector.load %arg0[%c4_62, %c0_63] : memref<8x256xf32, #tpu.memory_space<vmem>>, vector<4x256xf32>
    %125 = vector.extract_strided_slice %124 {offsets = [0, 0], sizes = [4, 239], strides = [1, 1]} : vector<4x256xf32> to vector<4x239xf32>
    %126 = vector.extract_strided_slice %18 {offsets = [0, 17], sizes = [4, 239], strides = [1, 1]} : vector<4x256xi1> to vector<4x239xi1>
    %c0_i32_64 = arith.constant 0 : i32
    %127 = arith.sitofp %c0_i32_64 : i32 to f32
    %128 = vector.broadcast %127 : f32 to vector<4x239xf32>
    %129 = arith.select %126, %125, %128 : vector<4x239xi1>, vector<4x239xf32>
    %c0_65 = arith.constant 0 : index
    %c17_66 = arith.constant 17 : index
    %130 = vector.load %arg6[%c0_65, %c17_66] : memref<36x256xf32, #tpu.memory_space<vmem>>, vector<4x239xf32>
    tpu.vector_store %arg6[%c0_65, %c17_66], %129 {strides = array<i32>} : memref<36x256xf32, #tpu.memory_space<vmem>>, vector<4x239xf32>,
    %131 = vector.extract_strided_slice %124 {offsets = [0, 0], sizes = [4, 240], strides = [1, 1]} : vector<4x256xf32> to vector<4x240xf32>
    %c4_67 = arith.constant 4 : index
    %c16_68 = arith.constant 16 : index
    %132 = vector.load %arg6[%c4_67, %c16_68] : memref<36x256xf32, #tpu.memory_space<vmem>>, vector<4x240xf32>
    tpu.vector_store %arg6[%c4_67, %c16_68], %131 {strides = array<i32>} : memref<36x256xf32, #tpu.memory_space<vmem>>, vector<4x240xf32>,
    %133 = vector.extract_strided_slice %124 {offsets = [0, 0], sizes = [4, 241], strides = [1, 1]} : vector<4x256xf32> to vector<4x241xf32>
    %134 = vector.extract_strided_slice %20 {offsets = [0, 15], sizes = [4, 241], strides = [1, 1]} : vector<4x256xi1> to vector<4x241xi1>
    %c0_i32_69 = arith.constant 0 : i32
    %135 = arith.sitofp %c0_i32_69 : i32 to f32
    %136 = vector.broadcast %135 : f32 to vector<4x241xf32>
    %137 = arith.select %134, %133, %136 : vector<4x241xi1>, vector<4x241xf32>
    %c8_70 = arith.constant 8 : index
    %c15_71 = arith.constant 15 : index
    %138 = vector.load %arg6[%c8_70, %c15_71] : memref<36x256xf32, #tpu.memory_space<vmem>>, vector<4x241xf32>
    tpu.vector_store %arg6[%c8_70, %c15_71], %137 {strides = array<i32>} : memref<36x256xf32, #tpu.memory_space<vmem>>, vector<4x241xf32>,
    %139 = vector.extract_strided_slice %124 {offsets = [0, 0], sizes = [4, 255], strides = [1, 1]} : vector<4x256xf32> to vector<4x255xf32>
    %140 = vector.extract_strided_slice %18 {offsets = [0, 1], sizes = [4, 255], strides = [1, 1]} : vector<4x256xi1> to vector<4x255xi1>
    %c0_i32_72 = arith.constant 0 : i32
    %141 = arith.sitofp %c0_i32_72 : i32 to f32
    %142 = vector.broadcast %141 : f32 to vector<4x255xf32>
    %143 = arith.select %140, %139, %142 : vector<4x255xi1>, vector<4x255xf32>
    %c12_73 = arith.constant 12 : index
    %c1_74 = arith.constant 1 : index
    %144 = vector.load %arg6[%c12_73, %c1_74] : memref<36x256xf32, #tpu.memory_space<vmem>>, vector<4x255xf32>
    tpu.vector_store %arg6[%c12_73, %c1_74], %143 {strides = array<i32>} : memref<36x256xf32, #tpu.memory_space<vmem>>, vector<4x255xf32>,
    %c16_75 = arith.constant 16 : index
    %c0_76 = arith.constant 0 : index
    %145 = vector.load %arg6[%c16_75, %c0_76] : memref<36x256xf32, #tpu.memory_space<vmem>>, vector<4x256xf32>
    tpu.vector_store %arg6[%c16_75, %c0_76], %124 {strides = array<i32>} : memref<36x256xf32, #tpu.memory_space<vmem>>, vector<4x256xf32>,
    %146 = vector.extract_strided_slice %124 {offsets = [0, 1], sizes = [4, 255], strides = [1, 1]} : vector<4x256xf32> to vector<4x255xf32>
    %147 = vector.extract_strided_slice %20 {offsets = [0, 0], sizes = [4, 255], strides = [1, 1]} : vector<4x256xi1> to vector<4x255xi1>
    %c0_i32_77 = arith.constant 0 : i32
    %148 = arith.sitofp %c0_i32_77 : i32 to f32
    %149 = vector.broadcast %148 : f32 to vector<4x255xf32>
    %150 = arith.select %147, %146, %149 : vector<4x255xi1>, vector<4x255xf32>
    %c20_78 = arith.constant 20 : index
    %c0_79 = arith.constant 0 : index
    %151 = vector.load %arg6[%c20_78, %c0_79] : memref<36x256xf32, #tpu.memory_space<vmem>>, vector<4x255xf32>
    tpu.vector_store %arg6[%c20_78, %c0_79], %150 {strides = array<i32>} : memref<36x256xf32, #tpu.memory_space<vmem>>, vector<4x255xf32>,
    %152 = vector.extract_strided_slice %124 {offsets = [0, 15], sizes = [4, 241], strides = [1, 1]} : vector<4x256xf32> to vector<4x241xf32>
    %153 = vector.extract_strided_slice %18 {offsets = [0, 0], sizes = [4, 241], strides = [1, 1]} : vector<4x256xi1> to vector<4x241xi1>
    %c0_i32_80 = arith.constant 0 : i32
    %154 = arith.sitofp %c0_i32_80 : i32 to f32
    %155 = vector.broadcast %154 : f32 to vector<4x241xf32>
    %156 = arith.select %153, %152, %155 : vector<4x241xi1>, vector<4x241xf32>
    %c24_81 = arith.constant 24 : index
    %c0_82 = arith.constant 0 : index
    %157 = vector.load %arg6[%c24_81, %c0_82] : memref<36x256xf32, #tpu.memory_space<vmem>>, vector<4x241xf32>
    tpu.vector_store %arg6[%c24_81, %c0_82], %156 {strides = array<i32>} : memref<36x256xf32, #tpu.memory_space<vmem>>, vector<4x241xf32>,
    %158 = vector.extract_strided_slice %124 {offsets = [0, 16], sizes = [4, 240], strides = [1, 1]} : vector<4x256xf32> to vector<4x240xf32>
    %c28_83 = arith.constant 28 : index
    %c0_84 = arith.constant 0 : index
    %159 = vector.load %arg6[%c28_83, %c0_84] : memref<36x256xf32, #tpu.memory_space<vmem>>, vector<4x240xf32>
    tpu.vector_store %arg6[%c28_83, %c0_84], %158 {strides = array<i32>} : memref<36x256xf32, #tpu.memory_space<vmem>>, vector<4x240xf32>,
    %160 = vector.extract_strided_slice %124 {offsets = [0, 17], sizes = [4, 239], strides = [1, 1]} : vector<4x256xf32> to vector<4x239xf32>
    %161 = vector.extract_strided_slice %20 {offsets = [0, 0], sizes = [4, 239], strides = [1, 1]} : vector<4x256xi1> to vector<4x239xi1>
    %c0_i32_85 = arith.constant 0 : i32
    %162 = arith.sitofp %c0_i32_85 : i32 to f32
    %163 = vector.broadcast %162 : f32 to vector<4x239xf32>
    %164 = arith.select %161, %160, %163 : vector<4x239xi1>, vector<4x239xf32>
    %c32_86 = arith.constant 32 : index
    %c0_87 = arith.constant 0 : index
    %165 = vector.load %arg6[%c32_86, %c0_87] : memref<36x256xf32, #tpu.memory_space<vmem>>, vector<4x239xf32>
    tpu.vector_store %arg6[%c32_86, %c0_87], %164 {strides = array<i32>} : memref<36x256xf32, #tpu.memory_space<vmem>>, vector<4x239xf32>,
    %c0_88 = arith.constant 0 : index
    %c0_89 = arith.constant 0 : index
    %166 = vector.load %arg6[%c0_88, %c0_89] : memref<36x256xf32, #tpu.memory_space<vmem>>, vector<36x256xf32>
    %cst_90 = arith.constant dense<0.000000e+00> : vector<4x256xf32>
    %167 = tpu.matmul %23, %166, %cst_90 {dimension_numbers = #tpu.dot_dimension_numbers<[1], [0], [0], [1], [0, 0, 1, 1], [], []>} : vector<4x36xf32>, vector<36x256xf32>, vector<4x256xf32> -> vector<4x256xf32>
    %168 = vector.broadcast %25 : vector<4x1xf32> to vector<4x256xf32>
    %169 = arith.addf %167, %168 : vector<4x256xf32>
    %cst_91 = arith.constant 0.000000e+00 : f32
    %170 = vector.broadcast %cst_91 : f32 to vector<4x256xf32>
    %171 = arith.maximumf %169, %170 : vector<4x256xf32>
    %172 = vector.extract_strided_slice %171 {offsets = [0, 0], sizes = [4, 239], strides = [1, 1]} : vector<4x256xf32> to vector<4x239xf32>
    %173 = vector.extract_strided_slice %18 {offsets = [0, 17], sizes = [4, 239], strides = [1, 1]} : vector<4x256xi1> to vector<4x239xi1>
    %c0_i32_92 = arith.constant 0 : i32
    %174 = arith.sitofp %c0_i32_92 : i32 to f32
    %175 = vector.broadcast %174 : f32 to vector<4x239xf32>
    %176 = arith.select %173, %172, %175 : vector<4x239xi1>, vector<4x239xf32>
    %c0_93 = arith.constant 0 : index
    %c17_94 = arith.constant 17 : index
    %177 = vector.load %arg6[%c0_93, %c17_94] : memref<36x256xf32, #tpu.memory_space<vmem>>, vector<4x239xf32>
    tpu.vector_store %arg6[%c0_93, %c17_94], %176 {strides = array<i32>} : memref<36x256xf32, #tpu.memory_space<vmem>>, vector<4x239xf32>,
    %178 = vector.extract_strided_slice %171 {offsets = [0, 0], sizes = [4, 240], strides = [1, 1]} : vector<4x256xf32> to vector<4x240xf32>
    %c4_95 = arith.constant 4 : index
    %c16_96 = arith.constant 16 : index
    %179 = vector.load %arg6[%c4_95, %c16_96] : memref<36x256xf32, #tpu.memory_space<vmem>>, vector<4x240xf32>
    tpu.vector_store %arg6[%c4_95, %c16_96], %178 {strides = array<i32>} : memref<36x256xf32, #tpu.memory_space<vmem>>, vector<4x240xf32>,
    %180 = vector.extract_strided_slice %171 {offsets = [0, 0], sizes = [4, 241], strides = [1, 1]} : vector<4x256xf32> to vector<4x241xf32>
    %181 = vector.extract_strided_slice %20 {offsets = [0, 15], sizes = [4, 241], strides = [1, 1]} : vector<4x256xi1> to vector<4x241xi1>
    %c0_i32_97 = arith.constant 0 : i32
    %182 = arith.sitofp %c0_i32_97 : i32 to f32
    %183 = vector.broadcast %182 : f32 to vector<4x241xf32>
    %184 = arith.select %181, %180, %183 : vector<4x241xi1>, vector<4x241xf32>
    %c8_98 = arith.constant 8 : index
    %c15_99 = arith.constant 15 : index
    %185 = vector.load %arg6[%c8_98, %c15_99] : memref<36x256xf32, #tpu.memory_space<vmem>>, vector<4x241xf32>
    tpu.vector_store %arg6[%c8_98, %c15_99], %184 {strides = array<i32>} : memref<36x256xf32, #tpu.memory_space<vmem>>, vector<4x241xf32>,
    %186 = vector.extract_strided_slice %171 {offsets = [0, 0], sizes = [4, 255], strides = [1, 1]} : vector<4x256xf32> to vector<4x255xf32>
    %187 = vector.extract_strided_slice %18 {offsets = [0, 1], sizes = [4, 255], strides = [1, 1]} : vector<4x256xi1> to vector<4x255xi1>
    %c0_i32_100 = arith.constant 0 : i32
    %188 = arith.sitofp %c0_i32_100 : i32 to f32
    %189 = vector.broadcast %188 : f32 to vector<4x255xf32>
    %190 = arith.select %187, %186, %189 : vector<4x255xi1>, vector<4x255xf32>
    %c12_101 = arith.constant 12 : index
    %c1_102 = arith.constant 1 : index
    %191 = vector.load %arg6[%c12_101, %c1_102] : memref<36x256xf32, #tpu.memory_space<vmem>>, vector<4x255xf32>
    tpu.vector_store %arg6[%c12_101, %c1_102], %190 {strides = array<i32>} : memref<36x256xf32, #tpu.memory_space<vmem>>, vector<4x255xf32>,
    %c16_103 = arith.constant 16 : index
    %c0_104 = arith.constant 0 : index
    %192 = vector.load %arg6[%c16_103, %c0_104] : memref<36x256xf32, #tpu.memory_space<vmem>>, vector<4x256xf32>
    tpu.vector_store %arg6[%c16_103, %c0_104], %171 {strides = array<i32>} : memref<36x256xf32, #tpu.memory_space<vmem>>, vector<4x256xf32>,
    %193 = vector.extract_strided_slice %171 {offsets = [0, 1], sizes = [4, 255], strides = [1, 1]} : vector<4x256xf32> to vector<4x255xf32>
    %194 = vector.extract_strided_slice %20 {offsets = [0, 0], sizes = [4, 255], strides = [1, 1]} : vector<4x256xi1> to vector<4x255xi1>
    %c0_i32_105 = arith.constant 0 : i32
    %195 = arith.sitofp %c0_i32_105 : i32 to f32
    %196 = vector.broadcast %195 : f32 to vector<4x255xf32>
    %197 = arith.select %194, %193, %196 : vector<4x255xi1>, vector<4x255xf32>
    %c20_106 = arith.constant 20 : index
    %c0_107 = arith.constant 0 : index
    %198 = vector.load %arg6[%c20_106, %c0_107] : memref<36x256xf32, #tpu.memory_space<vmem>>, vector<4x255xf32>
    tpu.vector_store %arg6[%c20_106, %c0_107], %197 {strides = array<i32>} : memref<36x256xf32, #tpu.memory_space<vmem>>, vector<4x255xf32>,
    %199 = vector.extract_strided_slice %171 {offsets = [0, 15], sizes = [4, 241], strides = [1, 1]} : vector<4x256xf32> to vector<4x241xf32>
    %200 = vector.extract_strided_slice %18 {offsets = [0, 0], sizes = [4, 241], strides = [1, 1]} : vector<4x256xi1> to vector<4x241xi1>
    %c0_i32_108 = arith.constant 0 : i32
    %201 = arith.sitofp %c0_i32_108 : i32 to f32
    %202 = vector.broadcast %201 : f32 to vector<4x241xf32>
    %203 = arith.select %200, %199, %202 : vector<4x241xi1>, vector<4x241xf32>
    %c24_109 = arith.constant 24 : index
    %c0_110 = arith.constant 0 : index
    %204 = vector.load %arg6[%c24_109, %c0_110] : memref<36x256xf32, #tpu.memory_space<vmem>>, vector<4x241xf32>
    tpu.vector_store %arg6[%c24_109, %c0_110], %203 {strides = array<i32>} : memref<36x256xf32, #tpu.memory_space<vmem>>, vector<4x241xf32>,
    %205 = vector.extract_strided_slice %171 {offsets = [0, 16], sizes = [4, 240], strides = [1, 1]} : vector<4x256xf32> to vector<4x240xf32>
    %c28_111 = arith.constant 28 : index
    %c0_112 = arith.constant 0 : index
    %206 = vector.load %arg6[%c28_111, %c0_112] : memref<36x256xf32, #tpu.memory_space<vmem>>, vector<4x240xf32>
    tpu.vector_store %arg6[%c28_111, %c0_112], %205 {strides = array<i32>} : memref<36x256xf32, #tpu.memory_space<vmem>>, vector<4x240xf32>,
    %207 = vector.extract_strided_slice %171 {offsets = [0, 17], sizes = [4, 239], strides = [1, 1]} : vector<4x256xf32> to vector<4x239xf32>
    %208 = vector.extract_strided_slice %20 {offsets = [0, 0], sizes = [4, 239], strides = [1, 1]} : vector<4x256xi1> to vector<4x239xi1>
    %c0_i32_113 = arith.constant 0 : i32
    %209 = arith.sitofp %c0_i32_113 : i32 to f32
    %210 = vector.broadcast %209 : f32 to vector<4x239xf32>
    %211 = arith.select %208, %207, %210 : vector<4x239xi1>, vector<4x239xf32>
    %c32_114 = arith.constant 32 : index
    %c0_115 = arith.constant 0 : index
    %212 = vector.load %arg6[%c32_114, %c0_115] : memref<36x256xf32, #tpu.memory_space<vmem>>, vector<4x239xf32>
    tpu.vector_store %arg6[%c32_114, %c0_115], %211 {strides = array<i32>} : memref<36x256xf32, #tpu.memory_space<vmem>>, vector<4x239xf32>,
    %c0_116 = arith.constant 0 : index
    %c0_117 = arith.constant 0 : index
    %213 = vector.load %arg6[%c0_116, %c0_117] : memref<36x256xf32, #tpu.memory_space<vmem>>, vector<36x256xf32>
    %cst_118 = arith.constant dense<0.000000e+00> : vector<4x256xf32>
    %214 = tpu.matmul %24, %213, %cst_118 {dimension_numbers = #tpu.dot_dimension_numbers<[1], [0], [0], [1], [0, 0, 1, 1], [], []>} : vector<4x36xf32>, vector<36x256xf32>, vector<4x256xf32> -> vector<4x256xf32>
    %215 = vector.broadcast %26 : vector<4x1xf32> to vector<4x256xf32>
    %216 = arith.addf %214, %215 : vector<4x256xf32>
    %217 = arith.addf %216, %124 : vector<4x256xf32>
    %cst_119 = arith.constant 0.000000e+00 : f32
    %218 = vector.broadcast %cst_119 : f32 to vector<4x256xf32>
    %219 = arith.maximumf %217, %218 : vector<4x256xf32>
    %c4_120 = arith.constant 4 : index
    %c0_121 = arith.constant 0 : index
    %220 = vector.load %arg5[%c4_120, %c0_121] : memref<8x256xf32, #tpu.memory_space<vmem>>, vector<4x256xf32>
    tpu.vector_store %arg5[%c4_120, %c0_121], %219 {strides = array<i32>} : memref<8x256xf32, #tpu.memory_space<vmem>>, vector<4x256xf32>,
    return
  }
}

</mosaic_0001>

<bundles_post_ra>
// kernel: tpu_custom_call.1
= control target key start
LH: loop header
LB: loop body
LE: loop exit
PB: predicated region body
PF: predicated region fallthrough
CT: control target
= control target key end

     0   :  { %10 = vsyncpa [#allocation4], 0  ;;  %s1393_s0 = inlined_call_operand.hbm [shape: f32[8,256], index: 0, kind: input, shape index: {}]   ;;  %s1394_s1 = inlined_call_operand.vmem [shape: f32[4,36], index: 1, kind: input, shape index: {}]   ;;  %s1395_s2 = inlined_call_operand.vmem [shape: f32[4,1], index: 2, kind: input, shape index: {}]   ;;  %s1396_s3 = inlined_call_operand.vmem [shape: f32[4,36], index: 3, kind: input, shape index: {}]   ;;  %s1397_s4 = inlined_call_operand.vmem [shape: f32[4,1], index: 4, kind: input, shape index: {}]   ;;  %s1398_s5 = inlined_call_operand.hbm [shape: f32[8,256], index: 5, kind: output, shape index: {}]  }
   0x1   :  { %11 = vsyncpa [#allocation5], 0  ;;  %s980_s18 = smov [#allocation3]  }
   0x2   :  { %s18_s19 = sshll.u32 %s980_s18, 4  ;;  %s19_s19 = int_to_ptr.vmem [resolvable:$true] %s18_s19 }
   0x3   :  { %s944_s20 = scalar_lea.vmem %s19_s19, 256  ;;  %p949_p1 = scmp.lt.s32.totalorder %s19_s19, %s19_s19 }
   0x4   :  { %p945_p0 = scmp.ne.s32.totalorder %s19_s19, %s944_s20  ;;  %p950_p2 = scmp.lt.s32.totalorder %s944_s20, %s944_s20 }
   0x6   :  { %p951_p3 = por %p950_p2, %p949_p1 }
   0x8   :  { %p952_p4 = pnand %p951_p3, %p945_p0 }
   0xa   :  { %955 = shalt.err (!%p952_p4)
}
   0xb   :  { %21 = dma.hbm_to_vmem [thread:$0]  %s1393_s0, 256, %s19_s19, [#allocation4]  }
   0xc   :  { %976 = dma.done.wait [#allocation4], 256  }
   0xd   :  { %977 = vsyncadd [#allocation4], 4294967040  ;;  %v981_v0 = vmov 0.0   ;;  %v1037_v1 = vld [vmem:[#allocation3] sm:$0xf]  ;;  %s982_s0 = smov 127   ;;  %v33_v11 = vlaneseq }
   0xe   :  { %68 = vst [vmem:[#allocation2 + $0x20] sm:$0xff] %v981_v0  ;;  %69 = vst [vmem:[#allocation2 + $0x28] sm:$0xff] %v981_v0  ;;  %288 = vmatprep.mubr.f32.mxu0 %v981_v0  ;;  %487 = vmatprep.mubr.f32.mxu1 %v981_v0  ;;  %v1039_v2 = vld [vmem:[#allocation3 + $0x8] sm:$0xf]  ;;  %s983_s23 = smov 111   ;;  %s984_s24 = smov 113  }
   0xf   :  { %64 = vst [vmem:[#allocation2] sm:$0xff] %v981_v0  ;;  %65 = vst [vmem:[#allocation2 + $0x8] sm:$0xff] %v981_v0  ;;  %142 = vrot.lane.b32.xlu1 %v1037_v1, %s982_s0  ;;  %185 = vrot.lane.b32.xlu0 %v1037_v1, %s983_s23  ;;  %s985_s25 = smov 1   ;;  %v96_v3 = vrot.slane %v1039_v2, 4  ;;  %v95_v4 = vrot.slane %v1037_v1, 4  ;;  %s986_s26 = smov 112  }
  0x10   :  { %66 = vst [vmem:[#allocation2 + $0x10] sm:$0xff] %v981_v0  ;;  %67 = vst [vmem:[#allocation2 + $0x18] sm:$0xff] %v981_v0  ;;  %s987_s27 = smov 15   ;;  %s988_s28 = smov 17   ;;  %v1071_v5 = vld [vmem:[#allocation3 + $0x8] sm:$0xf0] }
  0x11   :  { %70 = vst [vmem:[#allocation2 + $0x30] sm:$0xff] %v981_v0  ;;  %71 = vst [vmem:[#allocation2 + $0x38] sm:$0xff] %v981_v0  ;;  %v989_v6 = vmov 0   ;;  %s990_s29 = smov 16   ;;  %v1076_v7 = vrot.slane %v1071_v5, 4  ;;  %v34_v12 = vand.u32 127, %v33_v11 }
  0x12   :  { %72 = vst [vmem:[#allocation2 + $0x40] sm:$0xf] %v981_v0  ;;  %73 = vst [vmem:[#allocation2 + $0x48] sm:$0xf] %v981_v0  ;;  %935 = vset.pattern.permute.xlu0 %v989_v6  ;;  %v76_v8 = vld [vmem:[%s1395_s2] sm:$0xf] }
  0x13   :  { %140 = vst [vmem:[#allocation2 + $0x20] sm:$0xf] %v1037_v1  ;;  %141 = vst [vmem:[#allocation2 + $0x28] sm:$0xf] %v1039_v2  ;;  %144 = vrot.lane.b32.xlu1 %v1039_v2, %s982_s0  ;;  %187 = vrot.lane.b32.xlu0 %v1039_v2, %s983_s23  ;;  %v1081_v9 = vld [vmem:[#allocation3] sm:$0xf0] }
  0x14   :  { %v1086_v10 = vrot.slane %v1081_v9, 4  ;;  %v35_v13 = vadd.s32 128, %v34_v12  ;;  %v40_v15 = vand.u32 15, %v34_v12  ;;  %vm1405_vm1 = vcmask 1039360   ;;  %v1167_v12 = vld [vmem:[%s1394_s1] sm:$0xf] }
  0x15   :  { %vm1406_vm2 = vcmask 908288   ;;  %vm1408_vm4 = vcmask 904192   ;;  %vm1407_vm5 = vcmask 1039364   ;;  %vm165_vm6 = vcmask 924672  }
  0x16   :  { %v47_v14 = vand.u32 15, %v35_v13  ;;  %vm1110_vm3 = vcmp.le.s32.totalorder %v40_v15, 14  ;;  %vm172_vm8 = vcmask 920576   ;;  %vm1129_vm9 = vcmp.ge.s32.totalorder %v40_v15, 1 }
  0x17   :  { %163 = vrot.lane.b32.xlu1 %v1039_v2, %s984_s24  ;;  %161 = vrot.lane.b32.xlu0 %v1037_v1, %s984_s24  ;;  %vm1399_vm10 = vcmask 7168   ;;  %vm1400_vm11 = vcmask 1043456   ;;  %vm137_vm12 = vcmask 1047564   ;;  %vm1401_vm13 = vcmask 916484  }
  0x18   :  { %vm1106_vm0 = vcmp.le.s32.totalorder %v47_v14, 14  ;;  %vm1125_vm7 = vcmp.ge.s32.totalorder %v47_v14, 1  ;;  %vm1402_vm14 = vcmask 916480   ;;  %vm1403_vm15 = vcmask 121856  }
  0x1b   :  { %123 = vrot.lane.b32.xlu1 %v1039_v2, %s985_s25  ;;  %121 = vrot.lane.b32.xlu0 %v1037_v1, %s985_s25 }
  0x1f   :  { %176 = vrot.lane.b32.xlu1 %v96_v3, %s986_s26  ;;  %174 = vrot.lane.b32.xlu0 %v95_v4, %s986_s26 }
  0x23   :  { %110 = vrot.lane.b32.xlu1 %v1039_v2, %s987_s27  ;;  %108 = vrot.lane.b32.xlu0 %v1037_v1, %s987_s27 }
  0x27   :  { %84 = vrot.lane.b32.xlu1 %v1039_v2, %s988_s28  ;;  %82 = vrot.lane.b32.xlu0 %v1037_v1, %s988_s28 }
  0x2b   :  { %99 = vrot.lane.b32.xlu1 %v96_v3, %s990_s29  ;;  %97 = vrot.lane.b32.xlu0 %v95_v4, %s990_s29 }
  0x2f   :  { %210 = vperm.xlu0 %935, %v76_v8   ;;  %597 = vrot.lane.b32.xlu1 %v1076_v7, %s983_s23 }
  0x33   :  { %595 = vrot.lane.b32.xlu0 %v1086_v10, %s983_s23  ;;  %560 = vrot.lane.b32.xlu1 %v1076_v7, %s982_s0 }
  0x37   :  { %558 = vrot.lane.b32.xlu0 %v1086_v10, %s982_s0  ;;  %577 = vrot.lane.b32.xlu1 %v1076_v7, %s984_s24 }
  0x3b   :  { %575 = vrot.lane.b32.xlu0 %v1086_v10, %s984_s24  ;;  %539 = vrot.lane.b32.xlu1 %v1076_v7, %s985_s25 }
  0x3f   :  { %537 = vrot.lane.b32.xlu0 %v1086_v10, %s985_s25  ;;  %588 = vrot.lane.b32.xlu1 %v1071_v5, %s986_s26 }
  0x43   :  { %586 = vrot.lane.b32.xlu0 %v1081_v9, %s986_s26 }
  0x81   :  { %v143_v16 = vpop.permute.xlu1 %142  ;;  %v186_v17 = vpop.permute.xlu0 %185 }
  0x85   :  { %v145_v20 = vpop.permute.xlu1 %144  ;;  %v188_v21 = vpop.permute.xlu0 %187 }
  0x86   :  { %v147_v22 = vsel %vm1405_vm1, %v143_v16, %v145_v20  ;;  %v151_v23 = vsel %vm1106_vm0, %v145_v20, 0.0  ;;  %v190_v24 = vsel %vm1406_vm2, %v186_v17, %v188_v21  ;;  %v194_v25 = vsel %vm1106_vm0, %v188_v21, 0.0 }
  0x87   :  { %v150_v26 = vsel %vm1110_vm3, %v147_v22, 0.0  ;;  %v155_v27 = vrot.slane %v151_v23, 4  ;;  %v193_v28 = vsel %vm1110_vm3, %v190_v24, 0.0  ;;  %197 = vst.msk [vmem:[#allocation2 + $0x48] sm:$0xf] %vm1408_vm4, %v194_v25 }
  0x88   :  { %v154_v30 = vrot.slane %v150_v26, 4  ;;  %195 = vst [vmem:[#allocation2 + $0x40] sm:$0xf] %v193_v28 }
  0x89   :  { %160 = vst.msk [vmem:[#allocation2 + $0x28] sm:$0xf0] %vm1407_vm5, %v155_v27  ;;  %v164_v32 = vpop.permute.xlu1 %163  ;;  %v162_v33 = vpop.permute.xlu0 %161 }
  0x8a   :  { %158 = vst [vmem:[#allocation2 + $0x20] sm:$0xf0] %v154_v30  ;;  %v170_v34 = vsel %vm1125_vm7, %v164_v32, 0.0  ;;  %v166_v35 = vsel %vm165_vm6, %v162_v33, %v164_v32 }
  0x8b   :  { %173 = vst.msk [vmem:[#allocation2 + $0x38] sm:$0xf] %vm172_vm8, %v170_v34  ;;  %v169_v36 = vsel %vm1129_vm9, %v166_v35, 0.0 }
  0x8c   :  { %171 = vst [vmem:[#allocation2 + $0x30] sm:$0xf] %v169_v36 }
  0x8d   :  { %v124_v37 = vpop.permute.xlu1 %123  ;;  %v122_v38 = vpop.permute.xlu0 %121 }
  0x8e   :  { %v126_v39 = vsel %vm1399_vm10, %v122_v38, %v124_v37  ;;  %v129_v40 = vsel %vm1129_vm9, %v122_v38, 0.0  ;;  %v207_v41 = vld [vmem:[#allocation2 + $0x48] sm:$0xf]  ;;  %vm118_vm10 = vcmask 1043576  }
  0x8f   :  { %v130_v42 = vsel %vm1125_vm7, %v126_v39, 0.0  ;;  %v133_v43 = vrot.slane %v129_v40, 4  ;;  %911 = vmatprep.subr.msk.mxu0 %vm1400_vm11, %v207_v41  ;;  %v206_v44 = vld [vmem:[#allocation2 + $0x40] sm:$0xf] }
  0x90   :  { %v134_v45 = vrot.slane %v130_v42, 4  ;;  %912 = vmatpush1.msk.msra.mxu0 %vm1400_vm11, %v206_v44  ;;  %vm1404_vm11 = vcmask 138240   ;;  %v203_v61 = vld [vmem:[#allocation2 + $0x28] sm:$0xff] }
  0x91   :  { %v177_v46 = vpop.permute.xlu1 %176  ;;  %v175_v47 = vpop.permute.xlu0 %174  ;;  %138 = vst.msk [vmem:[#allocation2 + $0x10] sm:$0xf0] %vm137_vm12, %v133_v43  ;;  %v202_v62 = vld [vmem:[#allocation2 + $0x20] sm:$0xff] }
  0x92   :  { %139 = vst [vmem:[#allocation2 + $0x18] sm:$0xf0] %v134_v45  ;;  %184 = vst.msk [vmem:[#allocation2 + $0x38] sm:$0xf0] %vm1401_vm13, %v177_v46  ;;  %v179_v48 = vsel %vm1402_vm14, %v175_v47, %v177_v46  ;;  %vm92_vm13 = vcmask 1043592   ;;  %vm101_vm14 = vcmask 130048  }
  0x93   :  { %182 = vst [vmem:[#allocation2 + $0x30] sm:$0xf0] %v179_v48 }
  0x95   :  { %v111_v49 = vpop.permute.xlu1 %110  ;;  %v109_v50 = vpop.permute.xlu0 %108 }
  0x96   :  { %v113_v51 = vsel %vm1403_vm15, %v109_v50, %v111_v49  ;;  %v116_v52 = vsel %vm1110_vm3, %v109_v50, 0.0  ;;  %vm105_vm15 = vcmask 1047684  }
  0x97   :  { %v117_v53 = vsel %vm1106_vm0, %v113_v51, 0.0  ;;  %119 = vst.msk [vmem:[#allocation2 + $0x10] sm:$0xf] %vm118_vm10, %v116_v52 }
  0x98   :  { %120 = vst [vmem:[#allocation2 + $0x18] sm:$0xf] %v117_v53 }
  0x99   :  { %v85_v54 = vpop.permute.xlu1 %84  ;;  %v83_v55 = vpop.permute.xlu0 %82  ;;  %v205_v56 = vld [vmem:[#allocation2 + $0x38] sm:$0xff] }
  0x9a   :  { %v87_v57 = vsel %vm1404_vm11, %v83_v55, %v85_v54  ;;  %v90_v58 = vsel %vm1129_vm9, %v83_v55, 0.0  ;;  %248 = vmatprep.subr.mxu0 %v205_v56  ;;  %v204_v59 = vld [vmem:[#allocation2 + $0x30] sm:$0xff]  ;;  %vm213_vm11 = vcmask 293888  }
  0x9b   :  { %v91_v60 = vsel %vm1125_vm7, %v87_v57, 0.0  ;;  %93 = vst.msk [vmem:[#allocation2] sm:$0xf] %vm92_vm13, %v90_v58  ;;  %249 = vmatpush1.msra.mxu0 %v204_v59 }
  0x9c   :  { %94 = vst [vmem:[#allocation2 + $0x8] sm:$0xf] %v91_v60  ;;  %250 = vmatprep.subr.mxu0 %v203_v61 }
  0x9d   :  { %v100_v63 = vpop.permute.xlu1 %99  ;;  %v98_v3 = vpop.permute.xlu0 %97  ;;  %251 = vmatpush1.msra.mxu0 %v202_v62 }
  0x9e   :  { %v102_v4 = vsel %vm101_vm14, %v98_v3, %v100_v63  ;;  %106 = vst.msk [vmem:[#allocation2] sm:$0xf0] %vm105_vm15, %v98_v3  ;;  %v200_v8 = vld [vmem:[#allocation2 + $0x10] sm:$0xff] }
  0x9f   :  { %107 = vst [vmem:[#allocation2 + $0x8] sm:$0xf0] %v102_v4  ;;  %v201_v6 = vld [vmem:[#allocation2 + $0x18] sm:$0xff] }
  0xa0   :  { %252 = vmatprep.subr.mxu0 %v201_v6 }
  0xa1   :  { %253 = vmatpush1.msra.mxu0 %v200_v8  ;;  %v598_v25 = vpop.permute.xlu1 %597 }
  0xa2   :  { %v603_v52 = vsel %vm1106_vm0, %v598_v25, 0.0 }
  0xa5   :  { %v198_v13 = vld [vmem:[#allocation2] sm:$0xff]  ;;  %v561_v27 = vpop.permute.xlu1 %560 }
  0xa6   :  { %v199_v11 = vld [vmem:[#allocation2 + $0x8] sm:$0xff]  ;;  %v566_v63 = vsel %vm1106_vm0, %v561_v27, 0.0 }
  0xa7   :  { %254 = vmatprep.subr.mxu0 %v199_v11 }
  0xa8   :  { %255 = vmatpush1.msra.mxu0 %v198_v13 }
  0xa9   :  { %913 = vmatmul.mubr.msk.f32.vlgmr.msra.gmra.mxu0 %vm213_vm11, %v1167_v12  ;;  %v1204_v30 = vpop.permute.xlu1 %577 }
  0xaa   :  { %686 = vmatprep.mubr.f32.mxu0 %v981_v0  ;;  %v1172_v14 = vpop.permute.xlu0 %210 }
  0xad   :  { %v1208_v33 = vpop.permute.xlu1 %539 }
  0xae   :  { %v596_v26 = vpop.permute.xlu0 %595 }
  0xaf   :  { %v599_v50 = vsel %vm1406_vm2, %v596_v26, %v598_v25 }
  0xb0   :  { %v602_v60 = vsel %vm1110_vm3, %v599_v50, 0.0 }
  0xb1   :  { %v1212_v35 = vpop.permute.xlu1 %588 }
  0xb2   :  { %v559_v28 = vpop.permute.xlu0 %558 }
  0xb3   :  { %v562_v55 = vsel %vm1405_vm1, %v559_v28, %v561_v27 }
  0xb4   :  { %v565_v3 = vsel %vm1110_vm3, %v562_v55, 0.0 }
  0xb6   :  { %v1206_v32 = vpop.permute.xlu0 %575 }
  0xb7   :  { %v579_v50 = vsel %vm165_vm6, %v1206_v32, %v1204_v30 }
  0xba   :  { %v1210_v34 = vpop.permute.xlu0 %537 }
  0xbb   :  { %v544_v8 = vsel %vm1129_vm9, %v1210_v34, 0.0 }
 0x169   :  { %v290_v15 = vpop.f32.mrf.mxu0 }
 0x16a   :  { %v291_v16 = vadd.f32 %v290_v15, %v1172_v14  ;;  %v570_v15 = vrot.slane %v566_v63, 4 }
 0x16b   :  { %v292_v17 = vpop.f32.mrf.mxu0 }
 0x16c   :  { %v295_v20 = vmax.f32 %v291_v16, 0.0  ;;  %v293_v21 = vadd.f32 %v292_v17, %v1172_v14  ;;  %v569_v17 = vrot.slane %v565_v3, 4 }
 0x16e   :  { %349 = vst [vmem:[#allocation2 + $0x20] sm:$0xf] %v295_v20  ;;  %v296_v22 = vmax.f32 %v293_v21, 0.0  ;;  %351 = vrot.lane.b32.xlu0 %v295_v20, %s982_s0  ;;  %388 = vrot.lane.b32.xlu1 %v295_v20, %s983_s23  ;;  %v310_v23 = vrot.slane %v295_v20, 4 }
 0x170   :  { %350 = vst [vmem:[#allocation2 + $0x28] sm:$0xf] %v296_v22  ;;  %v311_v24 = vrot.slane %v296_v22, 4 }
 0x172   :  { %368 = vrot.lane.b32.xlu0 %v295_v20, %s984_s24  ;;  %390 = vrot.lane.b32.xlu1 %v296_v22, %s983_s23 }
 0x176   :  { %332 = vrot.lane.b32.xlu0 %v295_v20, %s985_s25  ;;  %353 = vrot.lane.b32.xlu1 %v296_v22, %s982_s0 }
 0x17a   :  { %321 = vrot.lane.b32.xlu0 %v295_v20, %s987_s27  ;;  %370 = vrot.lane.b32.xlu1 %v296_v22, %s984_s24 }
 0x17e   :  { %299 = vrot.lane.b32.xlu0 %v295_v20, %s988_s28  ;;  %334 = vrot.lane.b32.xlu1 %v296_v22, %s985_s25 }
 0x182   :  { %323 = vrot.lane.b32.xlu1 %v296_v22, %s987_s27  ;;  %379 = vrot.lane.b32.xlu0 %v310_v23, %s986_s26 }
 0x186   :  { %301 = vrot.lane.b32.xlu1 %v296_v22, %s988_s28  ;;  %526 = vrot.lane.b32.xlu0 %v1086_v10, %s987_s27  ;;  %v548_v22 = vrot.slane %v544_v8, 4 }
 0x18a   :  { %381 = vrot.lane.b32.xlu1 %v311_v24, %s986_s26  ;;  %312 = vrot.lane.b32.xlu0 %v310_v23, %s990_s29 }
 0x18e   :  { %528 = vrot.lane.b32.xlu1 %v1076_v7, %s987_s27  ;;  %506 = vrot.lane.b32.xlu0 %v1086_v10, %s988_s28 }
 0x192   :  { %314 = vrot.lane.b32.xlu1 %v311_v24, %s990_s29  ;;  %517 = vrot.lane.b32.xlu0 %v1081_v9, %s990_s29  ;;  %v1214_v9 = vpop.permute.xlu0 %586 }
 0x196   :  { %508 = vrot.lane.b32.xlu1 %v1076_v7, %s988_s28 }
 0x19a   :  { %519 = vrot.lane.b32.xlu1 %v1071_v5, %s990_s29 }
 0x1e0   :  { %v352_v36 = vpop.permute.xlu0 %351  ;;  %v389_v37 = vpop.permute.xlu1 %388 }
 0x1e4   :  { %v369_v38 = vpop.permute.xlu0 %368  ;;  %v391_v5 = vpop.permute.xlu1 %390 }
 0x1e5   :  { %v392_v39 = vsel %vm1406_vm2, %v389_v37, %v391_v5  ;;  %v396_v40 = vsel %vm1106_vm0, %v391_v5, 0.0 }
 0x1e6   :  { %v395_v41 = vsel %vm1110_vm3, %v392_v39, 0.0  ;;  %398 = vst.msk [vmem:[#allocation2 + $0x48] sm:$0xf] %vm1408_vm4, %v396_v40 }
 0x1e7   :  { %397 = vst [vmem:[#allocation2 + $0x40] sm:$0xf] %v395_v41 }
 0x1e8   :  { %v333_v42 = vpop.permute.xlu0 %332  ;;  %v354_v43 = vpop.permute.xlu1 %353 }
 0x1e9   :  { %v339_v44 = vsel %vm1129_vm9, %v333_v42, 0.0  ;;  %v355_v45 = vsel %vm1405_vm1, %v352_v36, %v354_v43  ;;  %v359_v46 = vsel %vm1106_vm0, %v354_v43, 0.0  ;;  %vm1417_vm1 = vcmask 1043456  }
 0x1ea   :  { %v343_v47 = vrot.slane %v339_v44, 4  ;;  %v358_v48 = vsel %vm1110_vm3, %v355_v45, 0.0  ;;  %v363_v49 = vrot.slane %v359_v46, 4  ;;  %vm1418_vm2 = vmmov %vm1417_vm1 }
 0x1eb   :  { %v362_v51 = vrot.slane %v358_v48, 4 }
 0x1ec   :  { %347 = vst.msk [vmem:[#allocation2 + $0x10] sm:$0xf0] %vm137_vm12, %v343_v47  ;;  %v322_v53 = vpop.permute.xlu0 %321  ;;  %v371_v54 = vpop.permute.xlu1 %370 }
 0x1ed   :  { %367 = vst.msk [vmem:[#allocation2 + $0x28] sm:$0xf0] %vm1407_vm5, %v363_v49  ;;  %366 = vst [vmem:[#allocation2 + $0x20] sm:$0xf0] %v362_v51  ;;  %v328_v56 = vsel %vm1110_vm3, %v322_v53, 0.0  ;;  %v372_v57 = vsel %vm165_vm6, %v369_v38, %v371_v54  ;;  %v376_v58 = vsel %vm1125_vm7, %v371_v54, 0.0 }
 0x1ee   :  { %v408_v59 = vld [vmem:[#allocation2 + $0x48] sm:$0xf]  ;;  %330 = vst.msk [vmem:[#allocation2 + $0x10] sm:$0xf] %vm118_vm10, %v328_v56  ;;  %v375_v61 = vsel %vm1129_vm9, %v372_v57, 0.0 }
 0x1ef   :  { %378 = vst.msk [vmem:[#allocation2 + $0x38] sm:$0xf] %vm172_vm8, %v376_v58  ;;  %914 = vmatprep.subr.msk.mxu1 %vm1417_vm1, %v408_v59  ;;  %v407_v62 = vld [vmem:[#allocation2 + $0x40] sm:$0xf]  ;;  %377 = vst [vmem:[#allocation2 + $0x30] sm:$0xf] %v375_v61 }
 0x1f0   :  { %605 = vst.msk [vmem:[#allocation2 + $0x48] sm:$0xf] %vm1408_vm4, %v603_v52  ;;  %915 = vmatpush1.msk.msra.mxu1 %vm1418_vm2, %v407_v62  ;;  %604 = vst [vmem:[#allocation2 + $0x40] sm:$0xf] %v602_v60  ;;  %v300_v4 = vpop.permute.xlu0 %299  ;;  %v335_v6 = vpop.permute.xlu1 %334  ;;  %vm1419_vm1 = vcmask 7168   ;;  %vm1420_vm2 = vcmask 121856  }
 0x1f1   :  { %v306_v11 = vsel %vm1129_vm9, %v300_v4, 0.0  ;;  %v336_v13 = vsel %vm1419_vm1, %v333_v42, %v335_v6  ;;  %vm1421_vm1 = vcmask 1043456   ;;  %v582_v58 = vsel %vm1129_vm9, %v579_v50, 0.0  ;;  %v1314_v6 = vld [vmem:[%s1396_s3] sm:$0xf] }
 0x1f2   :  { %308 = vst.msk [vmem:[#allocation2] sm:$0xf] %vm92_vm13, %v306_v11  ;;  %v340_v16 = vsel %vm1125_vm7, %v336_v13, 0.0  ;;  %vm1423_vm4 = vmmov %vm1421_vm1 }
 0x1f3   :  { %v344_v20 = vrot.slane %v340_v16, 4 }
 0x1f4   :  { %v404_v21 = vld [vmem:[#allocation2 + $0x28] sm:$0xff]  ;;  %v324_v23 = vpop.permute.xlu1 %323  ;;  %v380_v24 = vpop.permute.xlu0 %379  ;;  %v403_v25 = vld [vmem:[#allocation2 + $0x20] sm:$0xff] }
 0x1f5   :  { %557 = vst [vmem:[#allocation2 + $0x28] sm:$0xf] %v1076_v7  ;;  %574 = vst.msk [vmem:[#allocation2 + $0x28] sm:$0xf0] %vm1407_vm5, %v570_v15  ;;  %v325_v26 = vsel %vm1420_vm2, %v322_v53, %v324_v23  ;;  %v401_v28 = vld [vmem:[#allocation2 + $0x10] sm:$0xff]  ;;  %vm1422_vm5 = vcmask 7168  }
 0x1f6   :  { %348 = vst [vmem:[#allocation2 + $0x18] sm:$0xf0] %v344_v20  ;;  %556 = vst [vmem:[#allocation2 + $0x20] sm:$0xf] %v1086_v10  ;;  %v329_v36 = vsel %vm1106_vm0, %v325_v26, 0.0  ;;  %v541_v38 = vsel %vm1422_vm5, %v1210_v34, %v1208_v33  ;;  %vm1424_vm2 = vcmask 138240  }
 0x1f7   :  { %v615_v27 = vld [vmem:[#allocation2 + $0x48] sm:$0xf]  ;;  %573 = vst [vmem:[#allocation2 + $0x20] sm:$0xf0] %v569_v17  ;;  %v614_v37 = vld [vmem:[#allocation2 + $0x40] sm:$0xf] }
 0x1f8   :  { %917 = vmatprep.subr.msk.mxu0 %vm1421_vm1, %v615_v27  ;;  %552 = vst.msk [vmem:[#allocation2 + $0x10] sm:$0xf0] %vm137_vm12, %v548_v22  ;;  %331 = vst [vmem:[#allocation2 + $0x18] sm:$0xf] %v329_v36  ;;  %v302_v5 = vpop.permute.xlu1 %301  ;;  %v527_v39 = vpop.permute.xlu0 %526  ;;  %v545_v42 = vsel %vm1125_vm7, %v541_v38, 0.0  ;;  %vm1426_vm5 = vcmask 916484  }
 0x1f9   :  { %918 = vmatpush1.msk.msra.mxu0 %vm1423_vm4, %v614_v37  ;;  %v303_v40 = vsel %vm1424_vm2, %v300_v4, %v302_v5  ;;  %v533_v41 = vsel %vm1110_vm3, %v527_v39, 0.0  ;;  %v549_v44 = vrot.slane %v545_v42, 4  ;;  %vm1425_vm4 = vcmask 916480  }
 0x1fa   :  { %v307_v43 = vsel %vm1125_vm7, %v303_v40, 0.0  ;;  %535 = vst.msk [vmem:[#allocation2 + $0x10] sm:$0xf] %vm118_vm10, %v533_v41  ;;  %vm1427_vm1 = vcmask 121856   ;;  %v583_v53 = vsel %vm1125_vm7, %v1204_v30, 0.0  ;;  %vm1428_vm2 = vmmov %vm1425_vm4 }
 0x1fb   :  { %309 = vst [vmem:[#allocation2 + $0x8] sm:$0xf] %v307_v43  ;;  %v590_v32 = vsel %vm1428_vm2, %v1214_v9, %v1212_v35  ;;  %vm1432_vm2 = vcmask 904192  }
 0x1fc   :  { %v382_v33 = vpop.permute.xlu1 %381  ;;  %v313_v34 = vpop.permute.xlu0 %312  ;;  %v611_v8 = vld [vmem:[#allocation2 + $0x28] sm:$0xff] }
 0x1fd   :  { %v383_v45 = vsel %vm1425_vm4, %v380_v24, %v382_v33  ;;  %387 = vst.msk [vmem:[#allocation2 + $0x38] sm:$0xf0] %vm1426_vm5, %v382_v33  ;;  %vm1429_vm4 = vmmov %vm1426_vm5  ;;  %vm1430_vm5 = vcmask 138240  }
 0x1fe   :  { %319 = vst.msk [vmem:[#allocation2] sm:$0xf0] %vm105_vm15, %v313_v34  ;;  %386 = vst [vmem:[#allocation2 + $0x30] sm:$0xf0] %v383_v45  ;;  %v610_v11 = vld [vmem:[#allocation2 + $0x20] sm:$0xff] }
 0x1ff   :  { %v402_v46 = vld [vmem:[#allocation2 + $0x18] sm:$0xff] }
 0x200   :  { %553 = vst [vmem:[#allocation2 + $0x18] sm:$0xf0] %v549_v44  ;;  %v529_v47 = vpop.permute.xlu1 %528  ;;  %v507_v48 = vpop.permute.xlu0 %506 }
 0x201   :  { %v530_v49 = vsel %vm1427_vm1, %v527_v39, %v529_v47  ;;  %v513_v52 = vsel %vm1129_vm9, %v507_v48, 0.0  ;;  %v608_v15 = vld [vmem:[#allocation2 + $0x10] sm:$0xff]  ;;  %vm1431_vm1 = vcmask 908288  }
 0x202   :  { %v534_v51 = vsel %vm1106_vm0, %v530_v49, 0.0 }
 0x203   :  { %536 = vst [vmem:[#allocation2 + $0x18] sm:$0xf] %v534_v51 }
 0x204   :  { %v315_v54 = vpop.permute.xlu1 %314  ;;  %v406_v55 = vld [vmem:[#allocation2 + $0x38] sm:$0xff]  ;;  %v518_v56 = vpop.permute.xlu0 %517 }
 0x205   :  { %v399_v57 = vld [vmem:[#allocation2] sm:$0xff]  ;;  %v316_v59 = vsel %vm101_vm14, %v313_v34, %v315_v54  ;;  %447 = vmatprep.subr.mxu1 %v406_v55  ;;  %585 = vst.msk [vmem:[#allocation2 + $0x38] sm:$0xf] %vm172_vm8, %v583_v53  ;;  %v405_v30 = vld [vmem:[#allocation2 + $0x30] sm:$0xff] }
 0x206   :  { %594 = vst.msk [vmem:[#allocation2 + $0x38] sm:$0xf0] %vm1429_vm4, %v1212_v35  ;;  %320 = vst [vmem:[#allocation2 + $0x8] sm:$0xf0] %v316_v59  ;;  %448 = vmatpush1.msra.mxu1 %v405_v30  ;;  %vm1433_vm4 = vcmask 1039360  }
 0x207   :  { %515 = vst.msk [vmem:[#allocation2] sm:$0xf] %vm92_vm13, %v513_v52  ;;  %584 = vst [vmem:[#allocation2 + $0x30] sm:$0xf] %v582_v58  ;;  %449 = vmatprep.subr.mxu1 %v404_v21 }
 0x208   :  { %524 = vst.msk [vmem:[#allocation2] sm:$0xf0] %vm105_vm15, %v518_v56  ;;  %593 = vst [vmem:[#allocation2 + $0x30] sm:$0xf0] %v590_v32  ;;  %v509_v60 = vpop.permute.xlu1 %508  ;;  %450 = vmatpush1.msra.mxu1 %v403_v25 }
 0x209   :  { %451 = vmatprep.subr.mxu1 %v402_v46  ;;  %v510_v9 = vsel %vm1430_vm5, %v507_v48, %v509_v60  ;;  %vm1434_vm5 = vcmask 1039364  }
 0x20a   :  { %452 = vmatpush1.msra.mxu1 %v401_v28  ;;  %v514_v35 = vsel %vm1125_vm7, %v510_v9, 0.0  ;;  %v609_v13 = vld [vmem:[#allocation2 + $0x18] sm:$0xff] }
 0x20c   :  { %v520_v61 = vpop.permute.xlu1 %519 }
 0x20d   :  { %v613_v62 = vld [vmem:[#allocation2 + $0x38] sm:$0xff]  ;;  %v521_v63 = vsel %vm101_vm14, %v518_v56, %v520_v61  ;;  %v400_v3 = vld [vmem:[#allocation2 + $0x8] sm:$0xff] }
 0x20e   :  { %646 = vmatprep.subr.mxu0 %v613_v62  ;;  %453 = vmatprep.subr.mxu1 %v400_v3  ;;  %516 = vst [vmem:[#allocation2 + $0x8] sm:$0xf] %v514_v35  ;;  %525 = vst [vmem:[#allocation2 + $0x8] sm:$0xf0] %v521_v63 }
 0x20f   :  { %v612_v4 = vld [vmem:[#allocation2 + $0x30] sm:$0xff]  ;;  %454 = vmatpush1.msra.mxu1 %v399_v57  ;;  %v606_v17 = vld [vmem:[#allocation2] sm:$0xff] }
 0x210   :  { %647 = vmatpush1.msra.mxu0 %v612_v4  ;;  %916 = vmatmul.mubr.msk.f32.vlgmr.msra.gmra.mxu1 %vm213_vm11, %v1314_v6 }
 0x211   :  { %648 = vmatprep.subr.mxu0 %v611_v8  ;;  %877 = vmatprep.mubr.f32.mxu1 %v981_v0 }
 0x212   :  { %649 = vmatpush1.msra.mxu0 %v610_v11 }
 0x213   :  { %650 = vmatprep.subr.mxu0 %v609_v13 }
 0x214   :  { %651 = vmatpush1.msra.mxu0 %v608_v15 }
 0x215   :  { %v607_v16 = vld [vmem:[#allocation2 + $0x8] sm:$0xff] }
 0x216   :  { %652 = vmatprep.subr.mxu0 %v607_v16 }
 0x217   :  { %653 = vmatpush1.msra.mxu0 %v606_v17 }
 0x218   :  { %919 = vmatmul.mubr.msk.f32.vlgmr.msra.gmra.mxu0 %vm213_vm11, %v1167_v12 }
 0x2d0   :  { %v489_v16 = vpop.f32.mrf.mxu1 }
 0x2d8   :  { %v688_v20 = vpop.f32.mrf.mxu0 }
 0x2d9   :  { %v689_v21 = vadd.f32 %v688_v20, %v1172_v14  ;;  %v491_v20 = vpop.f32.mrf.mxu1 }
 0x2da   :  { %v690_v22 = vpop.f32.mrf.mxu0 }
 0x2db   :  { %v693_v23 = vmax.f32 %v689_v21, 0.0  ;;  %v691_v24 = vadd.f32 %v690_v22, %v1172_v14  ;;  %v77_v14 = vld [vmem:[%s1397_s4] sm:$0xf]  ;;  %s991_s4 = smov [#allocation6]  }
 0x2dc   :  { %s902_s10 = sshll.u32 %s991_s4, 4  ;;  %s903_s10 = int_to_ptr.vmem [resolvable:$true] %s902_s10 }
 0x2dd   :  { %747 = vst [vmem:[#allocation2 + $0x20] sm:$0xf] %v693_v23  ;;  %v694_v25 = vmax.f32 %v691_v24, 0.0  ;;  %786 = vrot.lane.b32.xlu0 %v693_v23, %s983_s23  ;;  %v708_v0 = vrot.slane %v693_v23, 4  ;;  %s956_s11 = scalar_lea.vmem %s903_s10, 256  ;;  %p961_p6 = scmp.lt.s32.totalorder %s903_s10, %s903_s10 }
 0x2de   :  { %p957_p5 = scmp.ne.s32.totalorder %s903_s10, %s956_s11  ;;  %p962_p7 = scmp.lt.s32.totalorder %s956_s11, %s956_s11 }
 0x2df   :  { %748 = vst [vmem:[#allocation2 + $0x28] sm:$0xf] %v694_v25  ;;  %788 = vrot.lane.b32.xlu1 %v694_v25, %s983_s23  ;;  %v709_v12 = vrot.slane %v694_v25, 4 }
 0x2e0   :  { %p963_p8 = por %p962_p7, %p961_p6 }
 0x2e1   :  { %749 = vrot.lane.b32.xlu0 %v693_v23, %s982_s0 }
 0x2e2   :  { %p964_p9 = pnand %p963_p8, %p957_p5 }
 0x2e3   :  { %751 = vrot.lane.b32.xlu1 %v694_v25, %s982_s0 }
 0x2e5   :  { %766 = vrot.lane.b32.xlu0 %v693_v23, %s984_s24 }
 0x2e7   :  { %768 = vrot.lane.b32.xlu1 %v694_v25, %s984_s24 }
 0x2e9   :  { %730 = vrot.lane.b32.xlu0 %v693_v23, %s985_s25 }
 0x2eb   :  { %732 = vrot.lane.b32.xlu1 %v694_v25, %s985_s25 }
 0x2ed   :  { %719 = vrot.lane.b32.xlu0 %v693_v23, %s987_s27 }
 0x2ef   :  { %721 = vrot.lane.b32.xlu1 %v694_v25, %s987_s27 }
 0x2f1   :  { %777 = vrot.lane.b32.xlu0 %v708_v0, %s986_s26 }
 0x2f3   :  { %779 = vrot.lane.b32.xlu1 %v709_v12, %s986_s26 }
 0x2f5   :  { %697 = vrot.lane.b32.xlu0 %v693_v23, %s988_s28 }
 0x2f7   :  { %699 = vrot.lane.b32.xlu1 %v694_v25, %s988_s28 }
 0x2f9   :  { %710 = vrot.lane.b32.xlu0 %v708_v0, %s990_s29 }
 0x2fb   :  { %712 = vrot.lane.b32.xlu1 %v709_v12, %s990_s29 }
 0x2fd   :  { %411 = vperm.xlu0 %935, %v77_v14  }
 0x34f   :  { %v787_v26 = vpop.permute.xlu0 %786 }
 0x351   :  { %v789_v27 = vpop.permute.xlu1 %788 }
 0x352   :  { %v790_v28 = vsel %vm1431_vm1, %v787_v26, %v789_v27  ;;  %v794_v36 = vsel %vm1106_vm0, %v789_v27, 0.0  ;;  %vm1435_vm1 = vcmask 1043456  }
 0x353   :  { %v793_v37 = vsel %vm1110_vm3, %v790_v28, 0.0  ;;  %796 = vst.msk [vmem:[#allocation2 + $0x48] sm:$0xf] %vm1432_vm2, %v794_v36  ;;  %v750_v38 = vpop.permute.xlu0 %749  ;;  %vm1436_vm2 = vmmov %vm1435_vm1 }
 0x354   :  { %795 = vst [vmem:[#allocation2 + $0x40] sm:$0xf] %v793_v37 }
 0x355   :  { %v752_v5 = vpop.permute.xlu1 %751 }
 0x356   :  { %v753_v39 = vsel %vm1433_vm4, %v750_v38, %v752_v5  ;;  %v757_v40 = vsel %vm1106_vm0, %v752_v5, 0.0  ;;  %vm1440_vm4 = vcmask 916484  }
 0x357   :  { %v756_v41 = vsel %vm1110_vm3, %v753_v39, 0.0  ;;  %v761_v42 = vrot.slane %v757_v40, 4  ;;  %v767_v43 = vpop.permute.xlu0 %766 }
 0x358   :  { %v760_v33 = vrot.slane %v756_v41, 4 }
 0x359   :  { %765 = vst.msk [vmem:[#allocation2 + $0x28] sm:$0xf0] %vm1434_vm5, %v761_v42  ;;  %v769_v34 = vpop.permute.xlu1 %768 }
 0x35a   :  { %764 = vst [vmem:[#allocation2 + $0x20] sm:$0xf0] %v760_v33  ;;  %v770_v44 = vsel %vm165_vm6, %v767_v43, %v769_v34  ;;  %v774_v45 = vsel %vm1125_vm7, %v769_v34, 0.0  ;;  %v806_v46 = vld [vmem:[#allocation2 + $0x48] sm:$0xf]  ;;  %vm1437_vm6 = vcmask 7168  }
 0x35b   :  { %v773_v47 = vsel %vm1129_vm9, %v770_v44, 0.0  ;;  %776 = vst.msk [vmem:[#allocation2 + $0x38] sm:$0xf] %vm172_vm8, %v774_v45  ;;  %920 = vmatprep.subr.msk.mxu1 %vm1435_vm1, %v806_v46  ;;  %v731_v48 = vpop.permute.xlu0 %730  ;;  %v805_v49 = vld [vmem:[#allocation2 + $0x40] sm:$0xf]  ;;  %vm1438_vm8 = vcmask 121856  }
 0x35c   :  { %775 = vst [vmem:[#allocation2 + $0x30] sm:$0xf] %v773_v47  ;;  %v737_v50 = vsel %vm1129_vm9, %v731_v48, 0.0  ;;  %921 = vmatpush1.msk.msra.mxu1 %vm1436_vm2, %v805_v49 }
 0x35d   :  { %v741_v51 = vrot.slane %v737_v50, 4  ;;  %v733_v52 = vpop.permute.xlu1 %732 }
 0x35e   :  { %v734_v53 = vsel %vm1437_vm6, %v731_v48, %v733_v52 }
 0x35f   :  { %745 = vst.msk [vmem:[#allocation2 + $0x10] sm:$0xf0] %vm137_vm12, %v741_v51  ;;  %v738_v54 = vsel %vm1125_vm7, %v734_v53, 0.0  ;;  %v720_v55 = vpop.permute.xlu0 %719  ;;  %vm1439_vm12 = vcmask 916480  }
 0x360   :  { %v742_v56 = vrot.slane %v738_v54, 4  ;;  %v726_v57 = vsel %vm1110_vm3, %v720_v55, 0.0  ;;  %vm1441_vm3 = vcmask 138240   ;;  %v802_v31 = vld [vmem:[#allocation2 + $0x28] sm:$0xff] }
 0x361   :  { %728 = vst.msk [vmem:[#allocation2 + $0x10] sm:$0xf] %vm118_vm10, %v726_v57  ;;  %v722_v58 = vpop.permute.xlu1 %721  ;;  %v801_v13 = vld [vmem:[#allocation2 + $0x20] sm:$0xff] }
 0x362   :  { %746 = vst [vmem:[#allocation2 + $0x18] sm:$0xf0] %v742_v56  ;;  %v723_v32 = vsel %vm1438_vm8, %v720_v55, %v722_v58 }
 0x363   :  { %v727_v59 = vsel %vm1106_vm0, %v723_v32, 0.0  ;;  %v778_v30 = vpop.permute.xlu0 %777 }
 0x364   :  { %729 = vst [vmem:[#allocation2 + $0x18] sm:$0xf] %v727_v59 }
 0x365   :  { %v780_v60 = vpop.permute.xlu1 %779 }
 0x366   :  { %v781_v9 = vsel %vm1439_vm12, %v778_v30, %v780_v60  ;;  %785 = vst.msk [vmem:[#allocation2 + $0x38] sm:$0xf0] %vm1440_vm4, %v780_v60 }
 0x367   :  { %784 = vst [vmem:[#allocation2 + $0x30] sm:$0xf0] %v781_v9  ;;  %v698_v61 = vpop.permute.xlu0 %697 }
 0x368   :  { %v704_v19 = vsel %vm1129_vm9, %v698_v61, 0.0  ;;  %v799_v29 = vld [vmem:[#allocation2 + $0x10] sm:$0xff] }
 0x369   :  { %706 = vst.msk [vmem:[#allocation2] sm:$0xf] %vm92_vm13, %v704_v19  ;;  %v700_v62 = vpop.permute.xlu1 %699 }
 0x36a   :  { %v701_v35 = vsel %vm1441_vm3, %v698_v61, %v700_v62 }
 0x36b   :  { %v705_v18 = vsel %vm1125_vm7, %v701_v35, 0.0  ;;  %v711_v63 = vpop.permute.xlu0 %710  ;;  %v800_v15 = vld [vmem:[#allocation2 + $0x18] sm:$0xff] }
 0x36c   :  { %707 = vst [vmem:[#allocation2 + $0x8] sm:$0xf] %v705_v18  ;;  %717 = vst.msk [vmem:[#allocation2] sm:$0xf0] %vm105_vm15, %v711_v63 }
 0x36d   :  { %v713_v3 = vpop.permute.xlu1 %712  ;;  %v804_v4 = vld [vmem:[#allocation2 + $0x38] sm:$0xff] }
 0x36e   :  { %v714_v8 = vsel %vm101_vm14, %v711_v63, %v713_v3  ;;  %837 = vmatprep.subr.mxu1 %v804_v4  ;;  %v803_v11 = vld [vmem:[#allocation2 + $0x30] sm:$0xff] }
 0x36f   :  { %718 = vst [vmem:[#allocation2 + $0x8] sm:$0xf0] %v714_v8  ;;  %838 = vmatpush1.msra.mxu1 %v803_v11 }
 0x370   :  { %839 = vmatprep.subr.mxu1 %v802_v31 }
 0x371   :  { %840 = vmatpush1.msra.mxu1 %v801_v13 }
 0x372   :  { %841 = vmatprep.subr.mxu1 %v800_v15 }
 0x373   :  { %842 = vmatpush1.msra.mxu1 %v799_v29  ;;  %v797_v21 = vld [vmem:[#allocation2] sm:$0xff] }
 0x376   :  { %v798_v17 = vld [vmem:[#allocation2 + $0x8] sm:$0xff] }
 0x377   :  { %843 = vmatprep.subr.mxu1 %v798_v17 }
 0x378   :  { %844 = vmatpush1.msra.mxu1 %v797_v21  ;;  %v412_v22 = vpop.permute.xlu0 %411 }
 0x379   :  { %v490_v23 = vadd.f32 %v489_v16, %v412_v22  ;;  %v492_v24 = vadd.f32 %v491_v20, %v412_v22  ;;  %922 = vmatmul.mubr.msk.f32.vlgmr.msra.gmra.mxu1 %vm213_vm11, %v1314_v6 }
 0x37b   :  { %v494_v25 = vadd.f32 %v490_v23, %v1037_v1  ;;  %v495_v0 = vadd.f32 %v492_v24, %v1039_v2 }
 0x37d   :  { %v496_v12 = vmax.f32 %v494_v25, 0.0  ;;  %v497_v14 = vmax.f32 %v495_v0, 0.0 }
 0x37f   :  { %498 = vst [vmem:[#allocation6] sm:$0xf] %v496_v12  ;;  %499 = vst [vmem:[#allocation6 + $0x8] sm:$0xf] %v497_v14 }
 0x439   :  { %v879_v26 = vpop.f32.mrf.mxu1 }
 0x43a   :  { %v880_v27 = vadd.f32 %v879_v26, %v412_v22 }
 0x43b   :  { %v881_v28 = vpop.f32.mrf.mxu1 }
 0x43c   :  { %v884_v36 = vadd.f32 %v880_v27, %v1086_v10  ;;  %v882_v37 = vadd.f32 %v881_v28, %v412_v22 }
 0x43e   :  { %v886_v38 = vmax.f32 %v884_v36, 0.0  ;;  %v885_v5 = vadd.f32 %v882_v37, %v1076_v7 }
 0x440   :  { %v890_v6 = vrot.slane %v886_v38, 4  ;;  %v887_v39 = vmax.f32 %v885_v5, 0.0 }
 0x442   :  { %894 = vst [vmem:[#allocation6] sm:$0xf0] %v890_v6  ;;  %v891_v1 = vrot.slane %v887_v39, 4 }
 0x444   :  { %895 = vst [vmem:[#allocation6 + $0x8] sm:$0xf0] %v891_v1 }
 0x445   :  { %967 = shalt.err (!%p964_p9)
}
 0x446   :  { %905 = dma.vmem_to_hbm [thread:$0]  %s903_s10, 256, %s1398_s5, [#allocation5]  }
 0x447   :  { %978 = dma.done.wait [#allocation5], 256  }
 0x448   :  { %979 = vsyncadd [#allocation5], 4294967040 }
 0x449   :  { %909 = vsyncpa [#allocation4], 1 }
 0x44a   :  { %910 = vsyncpa [#allocation5], 1 }

</bundles_post_ra>
